<compile_context>
chip_gen: v7x
topology: tpu7x:2x2x1
jax: 0.10.0
libtpu: 0.0.40
codegen_flags: <defaults>
</compile_context>

<pallas_src>
import jax
import jax.numpy as jnp
from jax.experimental import pallas as pl
from jax.experimental.pallas import tpu as pltpu


def _round_up(x, m):
    return ((x + m - 1) // m) * m


def _pad2(a, rows, cols):
    pr = rows - a.shape[0]
    pc = cols - a.shape[1]
    if pr or pc:
        a = jnp.pad(a, ((0, pr), (0, pc)))
    return a


def _mlp_forward_kernel(x_ref, w1_ref, b1_ref, w2_ref, b2_ref, wc_ref, bc_ref,
                        o_ref, acc_ref):
    # Grid: (batch_tile i, k_tile k).  Shapes (padded):
    #   x:  (TB, TK) bf16     w1: (TK, Hp) bf16    b1: (1, Hp) f32
    #   w2: (Hp, Hp) bf16     b2: (1, Hp) f32
    #   wc: (Hp, Cp) bf16     bc: (1, Cp) f32
    #   o:  (TB, Cp) f32      acc scratch: (TB, Hp) f32
    k = pl.program_id(1)

    @pl.when(k == 0)
    def _():
        acc_ref[...] = jnp.zeros_like(acc_ref)

    # Layer 1 partial product, f32 accumulation on the MXU.
    acc_ref[...] += jnp.dot(x_ref[...], w1_ref[...],
                            preferred_element_type=jnp.float32)

    @pl.when(k == pl.num_programs(1) - 1)
    def _():
        # Finish layer 1 (bias + ReLU in f32), then layers 2 and 3.
        h1 = jnp.maximum(acc_ref[...] + b1_ref[...], 0.0)
        h2 = jnp.dot(h1.astype(w2_ref.dtype), w2_ref[...],
                     preferred_element_type=jnp.float32) + b2_ref[...]
        h2 = jnp.maximum(h2, 0.0)
        out = jnp.dot(h2.astype(wc_ref.dtype), wc_ref[...],
                      preferred_element_type=jnp.float32) + bc_ref[...]
        o_ref[...] = out.astype(o_ref.dtype)


def algorithm_predict(x_nchw, params):
    """Forward pass of the Algorithm (ERM MLP featurizer + linear classifier)."""
    w1, b1, w2, b2, wc, bc = params
    B = x_nchw.shape[0]
    x = x_nchw.reshape(B, -1).astype(jnp.float32)   # NCHW -> (B, F), PyTorch order

    F_in = x.shape[1]
    H = w1.shape[1]
    C = wc.shape[1]

    LANE = 128
    TK = 512                                    # reduction tile over input features
    TB = 128 if B >= 128 else _round_up(max(B, 1), 16)   # batch tile (bf16 sublane=16)
    Bp = _round_up(B, TB)
    Fp = _round_up(F_in, TK)
    Hp = _round_up(H, LANE)                     # lane-dense hidden
    Cp = _round_up(C, LANE)                     # lane-dense output (no masked stores)

    # bf16 MXU operands (halves weight/input DMA bytes); biases stay f32.
    xp  = _pad2(x, Bp, Fp).astype(jnp.bfloat16)
    w1p = _pad2(w1, Fp, Hp).astype(jnp.bfloat16)
    w2p = _pad2(w2, Hp, Hp).astype(jnp.bfloat16)
    wcp = _pad2(wc, Hp, Cp).astype(jnp.bfloat16)
    b1p = _pad2(b1.reshape(1, -1).astype(jnp.float32), 1, Hp)
    b2p = _pad2(b2.reshape(1, -1).astype(jnp.float32), 1, Hp)
    bcp = _pad2(bc.reshape(1, -1).astype(jnp.float32), 1, Cp)

    nb = Bp // TB
    nk = Fp // TK

    # Right-size VMEM (double-buffered streamed tiles + resident weights + scratch).
    working = (
        2 * TB * TK * 2          # x tiles (bf16, double-buffered)
        + 2 * TK * Hp * 2        # w1 tiles (bf16, double-buffered)
        + 2 * Hp * Hp * 2        # w2 (resident)
        + 2 * Hp * Cp * 2        # wc (resident)
        + 2 * (Hp + Hp + Cp) * 4 # biases
        + 2 * TB * Cp * 4        # output tile
        + TB * Hp * 4            # f32 accumulator scratch
    )
    vmem_limit = int(min(48 << 20, max(16 << 20, 2 * working)))

    cost = pl.CostEstimate(
        flops=2 * Bp * (Fp * Hp + Hp * Hp + Hp * Cp),
        transcendentals=0,
        bytes_accessed=int(xp.size * 2 + w1p.size * 2 + w2p.size * 2 + wcp.size * 2
                           + (b1p.size + b2p.size + bcp.size) * 4 + Bp * Cp * 4),
    )

    out_padded = pl.pallas_call(
        _mlp_forward_kernel,
        out_shape=jax.ShapeDtypeStruct((Bp, Cp), jnp.float32),
        grid_spec=pltpu.PrefetchScalarGridSpec(
            num_scalar_prefetch=0,
            grid=(nb, nk),
            in_specs=[
                pl.BlockSpec((TB, TK), lambda i, k: (i, k)),   # x
                pl.BlockSpec((TK, Hp), lambda i, k: (k, 0)),   # w1 streamed over K
                pl.BlockSpec((1, Hp),  lambda i, k: (0, 0)),   # b1 resident
                pl.BlockSpec((Hp, Hp), lambda i, k: (0, 0)),   # w2 resident
                pl.BlockSpec((1, Hp),  lambda i, k: (0, 0)),   # b2 resident
                pl.BlockSpec((Hp, Cp), lambda i, k: (0, 0)),   # wc resident
                pl.BlockSpec((1, Cp),  lambda i, k: (0, 0)),   # bc resident
            ],
            out_specs=pl.BlockSpec((TB, Cp), lambda i, k: (i, 0)),
            scratch_shapes=[pltpu.VMEM((TB, Hp), jnp.float32)],
        ),
        compiler_params=pltpu.CompilerParams(
            dimension_semantics=("parallel", "arbitrary"),
            vmem_limit_bytes=vmem_limit,
        ),
        cost_estimate=cost,
    )(xp, w1p, b1p, w2p, b2p, wcp, bcp)

    return out_padded[:B, :C]


def init_params(key, in_features, hidden, num_classes):
    k1, k2, k3 = jax.random.split(key, 3)
    w1 = jax.random.normal(k1, (in_features, hidden), jnp.float32) * (
        1.0 / jnp.sqrt(in_features)
    )
    b1 = jnp.zeros((1, hidden), jnp.float32)
    w2 = jax.random.normal(k2, (hidden, hidden), jnp.float32) * (
        1.0 / jnp.sqrt(hidden)
    )
    b2 = jnp.zeros((1, hidden), jnp.float32)
    wc = jax.random.normal(k3, (hidden, num_classes), jnp.float32) * (
        1.0 / jnp.sqrt(hidden)
    )
    bc = jnp.zeros((1, num_classes), jnp.float32)
    return (w1, b1, w2, b2, wc, bc)


def _reference_forward(x_nchw, params):
    # Plain-JAX reference using the same bf16-operand / f32-accumulate recipe.
    w1, b1, w2, b2, wc, bc = params
    xb = x_nchw.reshape(x_nchw.shape[0], -1).astype(jnp.bfloat16)
    h = jnp.dot(xb, w1.astype(jnp.bfloat16),
                preferred_element_type=jnp.float32) + b1
    h = jnp.maximum(h, 0.0)
    h = jnp.dot(h.astype(jnp.bfloat16), w2.astype(jnp.bfloat16),
                preferred_element_type=jnp.float32) + b2
    h = jnp.maximum(h, 0.0)
    return jnp.dot(h.astype(jnp.bfloat16), wc.astype(jnp.bfloat16),
                   preferred_element_type=jnp.float32) + bc


if __name__ == "__main__":
    key = jax.random.PRNGKey(0)
    kx, kp = jax.random.split(key)

    # Small shapes consistent with the module's (input_shape, num_classes) API.
    batch, C, Hs, Ws = 2, 4, 16, 16     # input_shape = (4, 16, 16) -> F = 1024
    num_classes = 8
    hidden = 32

    x = jax.random.normal(kx, (batch, C, Hs, Ws), jnp.float32)  # NCHW like PyTorch
    params = init_params(kp, C * Hs * Ws, hidden, num_classes)

    logits = algorithm_predict(x, params)
    jax.block_until_ready(logits)

    ref = _reference_forward(x, params)
    assert logits.shape == (batch, num_classes)
    assert jnp.allclose(logits, ref, atol=1e-2, rtol=1e-2), (
        float(jnp.max(jnp.abs(logits - ref)))
    )

    print("KERNEL_OK")
</pallas_src>

<mosaic_0001>
module attributes {stable_mosaic.version = 11 : i64} {
  func.func @_mlp_forward_kernel(%arg0: i32, %arg1: i32, %arg2: memref<16x512xbf16, #tpu.memory_space<vmem>>, %arg3: memref<512x128xbf16, #tpu.memory_space<vmem>>, %arg4: memref<1x128xf32, #tpu.memory_space<vmem>>, %arg5: memref<128x128xbf16, #tpu.memory_space<vmem>>, %arg6: memref<1x128xf32, #tpu.memory_space<vmem>>, %arg7: memref<128x128xbf16, #tpu.memory_space<vmem>>, %arg8: memref<1x128xf32, #tpu.memory_space<vmem>>, %arg9: memref<16x128xf32, #tpu.memory_space<vmem>>, %arg10: memref<16x128xf32, #tpu.memory_space<vmem>>) attributes {dimension_semantics = [#tpu.dimension_semantics<parallel>, #tpu.dimension_semantics<arbitrary>], iteration_bounds = array<i64: 1, 2>, scalar_prefetch = 0 : i64, scratch_operands = 1 : i64, tpu.core_type = #tpu.core_type<tc>, window_params = [{transform_indices = @transform_0, window_bounds = array<i64: 16, 512>}, {transform_indices = @transform_1, window_bounds = array<i64: 512, 128>}, {pipeline_mode = #tpu.pipeline_mode<synchronous>, transform_indices = @transform_2, window_bounds = array<i64: 1, 128>}, {pipeline_mode = #tpu.pipeline_mode<synchronous>, transform_indices = @transform_3, window_bounds = array<i64: 128, 128>}, {pipeline_mode = #tpu.pipeline_mode<synchronous>, transform_indices = @transform_4, window_bounds = array<i64: 1, 128>}, {pipeline_mode = #tpu.pipeline_mode<synchronous>, transform_indices = @transform_5, window_bounds = array<i64: 128, 128>}, {pipeline_mode = #tpu.pipeline_mode<synchronous>, transform_indices = @transform_6, window_bounds = array<i64: 1, 128>}, {transform_indices = @transform_7, window_bounds = array<i64: 16, 128>}]} {
    %c0_i32 = arith.constant 0 : i32
    %0 = arith.cmpi eq, %arg1, %c0_i32 : i32
    %1 = arith.extui %0 : i1 to i32
    %c0_i32_0 = arith.constant 0 : i32
    %2 = arith.cmpi ne, %1, %c0_i32_0 : i32
    scf.if %2 {
      %cst_9 = arith.constant 0.000000e+00 : f32
      %12 = vector.broadcast %cst_9 : f32 to vector<16x128xf32>
      %c0_10 = arith.constant 0 : index
      %c0_11 = arith.constant 0 : index
      %13 = vector.load %arg10[%c0_10, %c0_11] : memref<16x128xf32, #tpu.memory_space<vmem>>, vector<16x128xf32>
      tpu.vector_store %arg10[%c0_10, %c0_11], %12 {strides = array<i32>} : memref<16x128xf32, #tpu.memory_space<vmem>>, vector<16x128xf32>,
    } else {
    }
    %c0 = arith.constant 0 : index
    %c0_1 = arith.constant 0 : index
    %3 = vector.load %arg10[%c0, %c0_1] : memref<16x128xf32, #tpu.memory_space<vmem>>, vector<16x128xf32>
    %c0_2 = arith.constant 0 : index
    %c0_3 = arith.constant 0 : index
    %4 = vector.load %arg2[%c0_2, %c0_3] : memref<16x512xbf16, #tpu.memory_space<vmem>>, vector<16x512xbf16>
    %c0_4 = arith.constant 0 : index
    %c0_5 = arith.constant 0 : index
    %5 = vector.load %arg3[%c0_4, %c0_5] : memref<512x128xbf16, #tpu.memory_space<vmem>>, vector<512x128xbf16>
    %cst = arith.constant dense<0.000000e+00> : vector<16x128xf32>
    %6 = tpu.matmul %4, %5, %cst {dimension_numbers = #tpu.dot_dimension_numbers<[1], [0], [0], [1], [0, 0, 1, 1], [], []>} : vector<16x512xbf16>, vector<512x128xbf16>, vector<16x128xf32> -> vector<16x128xf32>
    %7 = arith.addf %3, %6 : vector<16x128xf32>
    %c0_6 = arith.constant 0 : index
    %c0_7 = arith.constant 0 : index
    %8 = vector.load %arg10[%c0_6, %c0_7] : memref<16x128xf32, #tpu.memory_space<vmem>>, vector<16x128xf32>
    tpu.vector_store %arg10[%c0_6, %c0_7], %7 {strides = array<i32>} : memref<16x128xf32, #tpu.memory_space<vmem>>, vector<16x128xf32>,
    %c1_i32 = arith.constant 1 : i32
    %9 = arith.cmpi eq, %arg1, %c1_i32 : i32
    %10 = arith.extui %9 : i1 to i32
    %c0_i32_8 = arith.constant 0 : i32
    %11 = arith.cmpi ne, %10, %c0_i32_8 : i32
    scf.if %11 {
      %c0_9 = arith.constant 0 : index
      %c0_10 = arith.constant 0 : index
      %12 = vector.load %arg10[%c0_9, %c0_10] : memref<16x128xf32, #tpu.memory_space<vmem>>, vector<16x128xf32>
      %c0_11 = arith.constant 0 : index
      %c0_12 = arith.constant 0 : index
      %13 = vector.load %arg4[%c0_11, %c0_12] : memref<1x128xf32, #tpu.memory_space<vmem>>, vector<1x128xf32>
      %14 = vector.broadcast %13 : vector<1x128xf32> to vector<16x128xf32>
      %15 = arith.addf %12, %14 : vector<16x128xf32>
      %cst_13 = arith.constant 0.000000e+00 : f32
      %16 = vector.broadcast %cst_13 : f32 to vector<16x128xf32>
      %17 = arith.maximumf %15, %16 : vector<16x128xf32>
      %18 = arith.truncf %17 : vector<16x128xf32> to vector<16x128xbf16>
      %c0_14 = arith.constant 0 : index
      %c0_15 = arith.constant 0 : index
      %19 = vector.load %arg5[%c0_14, %c0_15] : memref<128x128xbf16, #tpu.memory_space<vmem>>, vector<128x128xbf16>
      %cst_16 = arith.constant dense<0.000000e+00> : vector<16x128xf32>
      %20 = tpu.matmul %18, %19, %cst_16 {dimension_numbers = #tpu.dot_dimension_numbers<[1], [0], [0], [1], [0, 0, 1, 1], [], []>} : vector<16x128xbf16>, vector<128x128xbf16>, vector<16x128xf32> -> vector<16x128xf32>
      %c0_17 = arith.constant 0 : index
      %c0_18 = arith.constant 0 : index
      %21 = vector.load %arg6[%c0_17, %c0_18] : memref<1x128xf32, #tpu.memory_space<vmem>>, vector<1x128xf32>
      %22 = vector.broadcast %21 : vector<1x128xf32> to vector<16x128xf32>
      %23 = arith.addf %20, %22 : vector<16x128xf32>
      %cst_19 = arith.constant 0.000000e+00 : f32
      %24 = vector.broadcast %cst_19 : f32 to vector<16x128xf32>
      %25 = arith.maximumf %23, %24 : vector<16x128xf32>
      %26 = arith.truncf %25 : vector<16x128xf32> to vector<16x128xbf16>
      %c0_20 = arith.constant 0 : index
      %c0_21 = arith.constant 0 : index
      %27 = vector.load %arg7[%c0_20, %c0_21] : memref<128x128xbf16, #tpu.memory_space<vmem>>, vector<128x128xbf16>
      %cst_22 = arith.constant dense<0.000000e+00> : vector<16x128xf32>
      %28 = tpu.matmul %26, %27, %cst_22 {dimension_numbers = #tpu.dot_dimension_numbers<[1], [0], [0], [1], [0, 0, 1, 1], [], []>} : vector<16x128xbf16>, vector<128x128xbf16>, vector<16x128xf32> -> vector<16x128xf32>
      %c0_23 = arith.constant 0 : index
      %c0_24 = arith.constant 0 : index
      %29 = vector.load %arg8[%c0_23, %c0_24] : memref<1x128xf32, #tpu.memory_space<vmem>>, vector<1x128xf32>
      %30 = vector.broadcast %29 : vector<1x128xf32> to vector<16x128xf32>
      %31 = arith.addf %28, %30 : vector<16x128xf32>
      %c0_25 = arith.constant 0 : index
      %c0_26 = arith.constant 0 : index
      %32 = vector.load %arg9[%c0_25, %c0_26] : memref<16x128xf32, #tpu.memory_space<vmem>>, vector<16x128xf32>
      tpu.vector_store %arg9[%c0_25, %c0_26], %31 {strides = array<i32>} : memref<16x128xf32, #tpu.memory_space<vmem>>, vector<16x128xf32>,
    } else {
    }
    return
  }
  func.func @transform_0(%arg0: i32, %arg1: i32) -> (i32, i32) {
    %c0_i32 = arith.constant 0 : i32
    return %arg0, %arg1 : i32, i32
  }
  func.func @transform_1(%arg0: i32, %arg1: i32) -> (i32, i32) {
    %c0_i32 = arith.constant 0 : i32
    %c0_i32_0 = arith.constant 0 : i32
    return %arg1, %c0_i32 : i32, i32
  }
  func.func @transform_2(%arg0: i32, %arg1: i32) -> (i32, i32) {
    %c0_i32 = arith.constant 0 : i32
    %c0_i32_0 = arith.constant 0 : i32
    %c0_i32_1 = arith.constant 0 : i32
    return %c0_i32, %c0_i32_0 : i32, i32
  }
  func.func @transform_3(%arg0: i32, %arg1: i32) -> (i32, i32) {
    %c0_i32 = arith.constant 0 : i32
    %c0_i32_0 = arith.constant 0 : i32
    %c0_i32_1 = arith.constant 0 : i32
    return %c0_i32, %c0_i32_0 : i32, i32
  }
  func.func @transform_4(%arg0: i32, %arg1: i32) -> (i32, i32) {
    %c0_i32 = arith.constant 0 : i32
    %c0_i32_0 = arith.constant 0 : i32
    %c0_i32_1 = arith.constant 0 : i32
    return %c0_i32, %c0_i32_0 : i32, i32
  }
  func.func @transform_5(%arg0: i32, %arg1: i32) -> (i32, i32) {
    %c0_i32 = arith.constant 0 : i32
    %c0_i32_0 = arith.constant 0 : i32
    %c0_i32_1 = arith.constant 0 : i32
    return %c0_i32, %c0_i32_0 : i32, i32
  }
  func.func @transform_6(%arg0: i32, %arg1: i32) -> (i32, i32) {
    %c0_i32 = arith.constant 0 : i32
    %c0_i32_0 = arith.constant 0 : i32
    %c0_i32_1 = arith.constant 0 : i32
    return %c0_i32, %c0_i32_0 : i32, i32
  }
  func.func @transform_7(%arg0: i32, %arg1: i32) -> (i32, i32) {
    %c0_i32 = arith.constant 0 : i32
    %c0_i32_0 = arith.constant 0 : i32
    return %arg0, %c0_i32 : i32, i32
  }
}

</mosaic_0001>

<bundles_post_ra>
// kernel: tpu_custom_call.1
= control target key start
LH: loop header
LB: loop body
LE: loop exit
PB: predicated region body
PF: predicated region fallthrough
CT: control target
= control target key end

     0   :  { %s2043_s0 = inlined_call_operand.hbm [shape: bf16[16,1024], index: 0, kind: input, shape index: {}]   ;;  %s2044_s1 = inlined_call_operand.hbm [shape: bf16[1024,128], index: 1, kind: input, shape index: {}]   ;;  %s2045_s2 = inlined_call_operand.vmem [shape: f32[1,128], index: 2, kind: input, shape index: {}]   ;;  %s2046_s3 = inlined_call_operand.hbm [shape: bf16[128,128], index: 3, kind: input, shape index: {}]   ;;  %s2047_s4 = inlined_call_operand.vmem [shape: f32[1,128], index: 4, kind: input, shape index: {}]   ;;  %s2048_s5 = inlined_call_operand.hbm [shape: bf16[128,128], index: 5, kind: input, shape index: {}]   ;;  %s2049_s6 = inlined_call_operand.vmem [shape: f32[1,128], index: 6, kind: input, shape index: {}]   ;;  %s2050_s7 = inlined_call_operand.hbm [shape: f32[16,128], index: 7, kind: output, shape index: {}]  }
   0x1   :  { %2056 = sst [smem:[#allocation19_spill]] %s2043_s0 }
   0x2   :  { %2057 = sst [smem:[#allocation20_spill]] %s2046_s3 }
   0x3   :  { %2058 = sst [smem:[#allocation21_spill]] %s2048_s5 }
   0x4   :  { %12 = vsyncpa [#allocation4], 0 }
   0x5   :  { %14 = vsyncpa [#allocation4 + $0x1], 0 }
   0x6   :  { %15 = vsyncpa [#allocation7], 0 }
   0x7   :  { %17 = vsyncpa [#allocation7 + $0x1], 0 }
   0x8   :  { %18 = vsyncpa [#allocation10], 0 }
   0x9   :  { %19 = vsyncpa [#allocation5], 0  ;;  %s1718_s24 = smov 0   ;;  %s1720_s25 = smov 0  }
   0xa   :  { %s1722_s26 = smov 0   ;;  %s1724_s27 = smov 0  }
   0xb   :  { %s1726_s28 = smov 0   ;;  %s1728_s29 = smov 0  }
   0xc LB: > { %s1747_s30 = sadd.s32 4294967295, %s1661_s29   ;;  %p53_p0 = scmp.ne.s32.totalorder %s1649_s26, %s1645_s25  ;;  %s1661_s29 = sphi %s1728_s29, %s25_s29   ;;  %s1657_s28 = sphi %s1726_s28, %s2082_s28   ;;  %s1653_s27 = sphi %s1724_s27, %s2081_s27   ;;  %s1649_s26 = sphi %s1722_s26, %s2080_s26   ;;  %s1645_s25 = sphi %s1720_s25, %s2079_s25   ;;  %s1641_s24 = sphi %s1718_s24, %s2078_s24  }
   0xd   : > { %p54_p1 = scmp.eq.s32.totalorder %s1661_s29, 0  ;;  %p59_p2 = scmp.ne.s32.totalorder %s1645_s25, %s1641_s24 }
   0xe   : > { %p2051_p3 = scmp.eq.s32.totalorder %s1747_s30, 0  ;;  %p1121_p5 = scmp.ge.s32.totalorder %s1661_s29, 1 }
   0xf   : > { %p55_p4 = por %p54_p1, %p53_p0  ;;  %p227_p7 = scmp.lt.s32.totalorder %s1661_s29, 3 }
  0x10   : > { %p1758_p6 = por %p2051_p3, %p59_p2  ;;  %s1663_s11 = smov [#allocation8]  }
  0x11   : > { %p1763_p8 = pnand %p1121_p5, %p227_p7  ;;  %s242_s12 = sshll.u32 %s1663_s11, 4  ;;  %s1767_s12 = int_to_ptr.vmem [resolvable:$true] %s242_s12 }
  0x12   : > { %s2059_s9 = scalar_select %p1758_p6, 1, 0 }
  0x13   : > { %p1317_p9 = pneg %p1763_p8  ;;  %p1333_p10 = scmp.lt.s32.totalorder %s1661_s29, 2 }
  0x14   : > { %s1664_s15 = smov [#allocation9]   ;;  %s2063_s3 = sld [smem:[#allocation20_spill]] }
  0x15   : > { %p1774_p11 = pnand %p1317_p9, %p2051_p3  ;;  %p1778_p12 = pnand %p1333_p10, %p55_p4 }
  0x16   : > { %s258_s16 = sshll.u32 %s1664_s15, 4  ;;  %s1782_s16 = int_to_ptr.vmem [resolvable:$true] %s258_s16 }
  0x17   : > { %p1455_p0 = pneg %p1774_p11 }
  0x1a   : > { %s1453_s19 = scalar_lea.hbm %s2063_s3, 1024 }
  0x1b   : > { %p1454_p13 = scmp.ne.s32.totalorder %s2063_s3, %s1453_s19  ;;  %p1460_p4 = scmp.lt.u32.totalorder %s1453_s19, %s2063_s3 }
  0x1d   : > { %p1456_p1 = pnand %p1455_p0, %p1454_p13 }
  0x1f   : > { %p1457_p2 = pneg %p1456_p1 }
  0x21   : > { %p1462_p5 = pnand %p1460_p4, %p1457_p2 }
  0x23   : > { %1465 = shalt.err (!%p1462_p5)
}
  0x24   : > { %s1466_s24 = scalar_lea.vmem %s1767_s12, 1024  ;;  %p1474_p3 = scmp.lt.s32.totalorder %s1767_s12, %s1767_s12 }
  0x25   : > { %p1467_p7 = scmp.ne.s32.totalorder %s1767_s12, %s1466_s24  ;;  %p1475_p13 = scmp.lt.s32.totalorder %s1466_s24, %s1466_s24 }
  0x27   : > { %p1469_p9 = pnand %p1467_p7, %p1455_p0  ;;  %p1476_p1 = por %p1475_p13, %p1474_p3 }
  0x29   : > { %p1470_p10 = pneg %p1469_p9 }
  0x2b   : > { %p1477_p6 = pnand %p1476_p1, %p1470_p10 }
  0x2d   : > { %1480 = shalt.err (!%p1477_p6)
}
  0x2e   : > { %s2053_s11 = smov 64   ;;  %s2054_s15 = smov 4  }
  0x2f   : > { %1320 = dma.hbm_to_vmem [thread:$0]  (!%p1774_p11), %s2063_s3, 1024, %s1767_s12, [#allocation7], %s2053_s11, %s2053_s11, %s2054_s15  }
  0x30   : > { %s2064_s5 = sld [smem:[#allocation21_spill]] }
  0x36   : > { %s1481_s21 = scalar_lea.hbm %s2064_s5, 1024 }
  0x37   : > { %p1482_p3 = scmp.ne.s32.totalorder %s2064_s5, %s1481_s21  ;;  %p1488_p4 = scmp.lt.u32.totalorder %s1481_s21, %s2064_s5 }
  0x39   : > { %p1484_p6 = pnand %p1482_p3, %p1455_p0 }
  0x3b   : > { %p1485_p2 = pneg %p1484_p6 }
  0x3d   : > { %p1490_p5 = pnand %p1488_p4, %p1485_p2 }
  0x3f   : > { %1493 = shalt.err (!%p1490_p5)
}
  0x40   : > { %s1494_s12 = scalar_lea.vmem %s1782_s16, 1024  ;;  %p1502_p13 = scmp.lt.s32.totalorder %s1782_s16, %s1782_s16 }
  0x41   : > { %p1495_p7 = scmp.ne.s32.totalorder %s1782_s16, %s1494_s12  ;;  %p1503_p1 = scmp.lt.s32.totalorder %s1494_s12, %s1494_s12 }
  0x43   : > { %p1497_p9 = pnand %p1495_p7, %p1455_p0  ;;  %p1504_p3 = por %p1503_p1, %p1502_p13 }
  0x45   : > { %p1498_p10 = pneg %p1497_p9 }
  0x47   : > { %p1505_p6 = pnand %p1504_p3, %p1498_p10 }
  0x49   : > { %1508 = shalt.err (!%p1505_p6)
}
  0x4a   : > { %1323 = dma.hbm_to_vmem [thread:$0]  (!%p1774_p11), %s2064_s5, 1024, %s1782_s16, [#allocation10], %s2053_s11, %s2053_s11, %s2054_s15  }
  0x4b   : > { %s1843_s18 = sand.u32 1, %s1649_s26   ;;  %s34_s13 = sadd.s32 1, %s1657_s28 }
  0x4c   : > { %p35_p0 = scmp.ge.s32.totalorder %s34_s13, 2  ;;  %s1125_s19 = sshll.u32 %s1843_s18, 5 }
  0x4d   : > { %s1197_s20 = sshll.u32 %s1657_s28, 8  ;;  %s2066_s0 = sld [smem:[#allocation19_spill]] }
  0x4e   : > { %s2084_s13 = smov (%p35_p0, %s34_s13), 0  ;;  %s279_s16 = scalar_lea.vmem [#allocation3], %s1125_s19 }
  0x4f   : > { %2065 = sst [smem:[#allocation17_spill]] %s2084_s13  ;;  %s289_s24 = sshll.u32 %s279_s16, 4  ;;  %s1857_s24 = int_to_ptr.vmem [resolvable:$true] %s289_s24 }
  0x50   : > { %s42_s12 = ssub.s32 %s1657_s28, %s2084_s13  ;;  %s2067_s8 = sadd.s32 1, %s1649_s26 }
  0x51   : > { %p44_p11 = scmp.eq.s32.totalorder %s42_s12, 0  ;;  %s276_s11 = scalar_lea.sflag [#allocation4], %s1843_s18 }
  0x52   : > { %p1511_p4 = pneg %p1778_p12 }
  0x53   : > { %s1853_s23 = scalar_lea.hbm %s2066_s0, %s1197_s20  ;;  %s1514_s21 = scalar_lea.hbm %s2066_s0, 1024 }
  0x54   : > { %s1862_s17 = scalar_select %p44_p11, %s1649_s26, %s2067_s8  }
  0x55   : > { %s1509_s15 = scalar_lea.hbm %s1853_s23, 512  ;;  %p1515_p9 = scmp.lt.u32.totalorder %s1853_s23, %s2066_s0 }
  0x56   : > { %2068 = sst [smem:[#allocation18_spill]] %s1862_s17  ;;  %p1510_p2 = scmp.ne.s32.totalorder %s1853_s23, %s1509_s15 }
  0x57   : > { %p1516_p10 = scmp.lt.u32.totalorder %s1514_s21, %s1509_s15  ;;  %p1518_p1 = scmp.lt.u32.totalorder %s1509_s15, %s1853_s23 }
  0x58   : > { %p1512_p5 = pnand %p1511_p4, %p1510_p2 }
  0x59   : > { %p1517_p13 = por %p1516_p10, %p1515_p9 }
  0x5a   : > { %p1513_p7 = pneg %p1512_p5 }
  0x5b   : > { %p1519_p3 = por %p1518_p1, %p1517_p13 }
  0x5d   : > { %p1520_p6 = pnand %p1519_p3, %p1513_p7 }
  0x5f   : > { %1523 = shalt.err (!%p1520_p6)
}
  0x60   : > { %s1524_s12 = scalar_lea.vmem %s1857_s24, 512  ;;  %s1667_s8 = smov [#allocation3]  }
  0x61   : > { %p1525_p0 = scmp.ne.s32.totalorder %s1857_s24, %s1524_s12  ;;  %s1529_s20 = sshll.u32 %s1667_s8, 4  ;;  %s1530_s20 = int_to_ptr.vmem [resolvable:$false] %s1529_s20 }
  0x62   : > { %s1531_s19 = scalar_lea.vmem %s1530_s20, 1024  ;;  %p1532_p5 = scmp.lt.s32.totalorder %s1857_s24, %s1530_s20 }
  0x63   : > { %p1527_p11 = pnand %p1525_p0, %p1511_p4  ;;  %p1533_p9 = scmp.lt.s32.totalorder %s1531_s19, %s1524_s12 }
  0x65   : > { %p1528_p2 = pneg %p1527_p11  ;;  %p1534_p10 = por %p1533_p9, %p1532_p5 }
  0x67   : > { %p1535_p13 = pnand %p1534_p10, %p1528_p2 }
  0x69   : > { %1538 = shalt.err (!%p1535_p13)
}
  0x6a   : > { %s1668_s15 = smov 512   ;;  %s1669_s21 = smov 256  }
  0x6b   : > { %s1670_s22 = smov 16   ;;  %s299_s16 = sand.u32 1, %s1661_s29  }
  0x6c   : > { %1327 = dma.hbm_to_vmem [thread:$0]  (!%p1778_p12), %s1853_s23, 512, %s1857_s24, %s276_s11, %s1668_s15, %s1669_s21, %s1670_s22  }
  0x6d   : > { %s1128_s8 = sshll.u32 %s1843_s18, 8  ;;  %s1198_s12 = sshll.u32 %s1657_s28, 12 }
  0x6e   : > { %s303_s20 = scalar_lea.vmem [#allocation6], %s1128_s8  ;;  %s1898_s5 = scalar_lea.hbm %s2044_s1, %s1198_s12 }
  0x6f   : > { %s310_s19 = sshll.u32 %s303_s20, 4  ;;  %s1902_s13 = scalar_lea.sflag [#allocation7], %s299_s16  ;;  %s1900_s19 = int_to_ptr.vmem [resolvable:$true] %s310_s19 }
  0x70   : > { %s1539_s17 = scalar_lea.hbm %s1898_s5, 4096  ;;  %s1544_s0 = scalar_lea.hbm %s2044_s1, 8192 }
  0x71   : > { %p1540_p7 = scmp.ne.s32.totalorder %s1898_s5, %s1539_s17  ;;  %p1545_p6 = scmp.lt.u32.totalorder %s1898_s5, %s2044_s1 }
  0x72   : > { %p1546_p0 = scmp.lt.u32.totalorder %s1544_s0, %s1539_s17  ;;  %p1548_p2 = scmp.lt.u32.totalorder %s1539_s17, %s1898_s5 }
  0x73   : > { %p1542_p1 = pnand %p1540_p7, %p1511_p4 }
  0x74   : > { %p1547_p11 = por %p1546_p0, %p1545_p6 }
  0x75   : > { %p1543_p3 = pneg %p1542_p1 }
  0x76   : > { %p1549_p5 = por %p1548_p2, %p1547_p11 }
  0x78   : > { %p1550_p9 = pnand %p1549_p5, %p1543_p3 }
  0x7a   : > { %1553 = shalt.err (!%p1550_p9)
}
  0x7b   : > { %s1554_s24 = scalar_lea.vmem %s1900_s19, 4096  ;;  %s1671_s15 = smov [#allocation6]  }
  0x7c   : > { %p1555_p10 = scmp.ne.s32.totalorder %s1900_s19, %s1554_s24  ;;  %s1559_s21 = sshll.u32 %s1671_s15, 4  ;;  %s1560_s21 = int_to_ptr.vmem [resolvable:$false] %s1559_s21 }
  0x7d   : > { %s1561_s22 = scalar_lea.vmem %s1560_s21, 8192  ;;  %p1562_p1 = scmp.lt.s32.totalorder %s1900_s19, %s1560_s21 }
  0x7e   : > { %p1557_p13 = pnand %p1555_p10, %p1511_p4  ;;  %p1563_p6 = scmp.lt.s32.totalorder %s1561_s22, %s1554_s24 }
  0x80   : > { %p1558_p7 = pneg %p1557_p13  ;;  %p1564_p0 = por %p1563_p6, %p1562_p1 }
  0x82   : > { %p1565_p11 = pnand %p1564_p0, %p1558_p7 }
  0x84   : > { %1568 = shalt.err (!%p1565_p11)
}
  0x85   : > { %s2069_s17 = smov 4   ;;  %s2070_s16 = smov 64  }
  0x86   : > { %1330 = dma.hbm_to_vmem [thread:$0]  (!%p1778_p12), %s1898_s5, 4096, %s1900_s19, %s1902_s13, %s2070_s16, %s2070_s16, %s2069_s17  }
  0x87   : > { %322 = sbr.rel (%p1763_p8) target bundleno = 894 (0x37e), region = 48  ;;  %s324_s8 = sand.u32 (!%p1763_p8), 1, %s1645_s25  }
  0x88   : > { %s1132_s12 = sshll.u32 (!%p1763_p8), %s324_s8, 5  ;;  %s325_s20 = scalar_lea.sflag (!%p1763_p8), [#allocation4], %s324_s8 }
  0x89   : > { %s1934_s11 = scalar_lea.vmem (!%p1763_p8), [#allocation3], %s1132_s12  ;;  %p2071_p4 = scmp.ne.s32.totalorder (!%p1763_p8), %s2059_s9, 0 }
  0x8e   : > { %1620 = dma.done.wait (%p2071_p4), %s325_s20, 512  }
  0x8f   : > { %1622 = vsyncadd (%p2071_p4), %s325_s20, 4294966784  ;;  %s333_s14 = sand.u32 1, %s1747_s30   ;;  %s1133_s18 = sshll.u32 %s324_s8, 8 }
  0x90   : > { %s334_s5 = scalar_lea.sflag [#allocation7], %s333_s14  ;;  %s1941_s13 = scalar_lea.vmem [#allocation6], %s1133_s18 }
  0x91   : > { %1624 = dma.done.wait (%p2071_p4), %s334_s5, 4096  }
  0x92   : > { %1626 = vsyncadd (%p2071_p4), %s334_s5, 4294963200  ;;  %p2072_p8 = scmp.eq.s32.totalorder %s1747_s30, 0 }
  0x94   : > { %1628 = dma.done.wait (%p2072_p8), [#allocation7], 1024   ;;  %p2073_p12 = pmov %p2072_p8 }
  0x95   : > { %p2074_p3 = pmov %p2072_p8 }
  0x96   : > { %1630 = vsyncadd (%p2073_p12), [#allocation7], 4294966272 }
  0x97   : > { %1632 = dma.done.wait (%p2074_p3), [#allocation10], 1024   ;;  %p2075_p2 = pmov %p2074_p3 }
  0x98   : > { %p1136_p5 = scmp.ne.s32.totalorder %s1653_s27, 0 }
  0x99   : > { %1634 = vsyncadd (%p2075_p2), [#allocation10], 4294966272  ;;  %v1672_v0 = vmov (!%p1136_p5), 0.0  }
  0x9a   : > { %384 = sbr.rel (%p1136_p5) target bundleno = 161 (0xa1), region = 68  ;;  %385 = vst [vmem:[#allocation2] sm:$0xff] (!%p1136_p5), %v1672_v0  ;;  %386 = vst [vmem:[#allocation2 + $0x8] sm:$0xff] (!%p1136_p5), %v1672_v0 }
  0xa1 PF: > { %v1399_v1 = vld [vmem:[%s1941_s13 + $0x40] sm:$0xff]   ;;  %v1403_v5 = vld [vmem:[%s1941_s13 + $0x48] sm:$0xff]   ;;  %v1407_v9 = vld [vmem:[%s1941_s13 + $0x50] sm:$0xff]   ;;  %p1173_p9 = scmp.ne.s32.totalorder %s1653_s27, 1 }
  0xa2   : > { %v1400_v2 = vld [vmem:[%s1941_s13 + $0xc0] sm:$0xff]   ;;  %1199 = vmatprep.subr.bf16.mxu0 %v1399_v1  ;;  %v1404_v6 = vld [vmem:[%s1941_s13 + $0xc8] sm:$0xff]   ;;  %v1408_v10 = vld [vmem:[%s1941_s13 + $0xd0] sm:$0xff]   ;;  %v1673_v56 = vmov (!%p1173_p9), 0.0   ;;  %vm1674_vm0 = vmmov (!%p1173_p9), 0  }
  0xa3   : > { %v1401_v3 = vld [vmem:[%s1941_s13] sm:$0xff]   ;;  %1221 = vmatprep.subr.bf16.mxu1 %v1400_v2  ;;  %v1405_v7 = vld [vmem:[%s1941_s13 + $0x8] sm:$0xff]   ;;  %v1409_v11 = vld [vmem:[%s1941_s13 + $0x10] sm:$0xff]  }
  0xa4   : > { %v1402_v4 = vld [vmem:[%s1941_s13 + $0x80] sm:$0xff]   ;;  %1200 = vmatpush3.bf16.msra.mxu0 %v1401_v3  ;;  %v1406_v8 = vld [vmem:[%s1941_s13 + $0x88] sm:$0xff]   ;;  %v1410_v12 = vld [vmem:[%s1941_s13 + $0x90] sm:$0xff]  }
  0xa5   : > { %1222 = vmatpush3.bf16.msra.mxu1 %v1402_v4  ;;  %1201 = vmatprep.subr.bf16.mxu0 %v1403_v5  ;;  %v1411_v13 = vld [vmem:[%s1941_s13 + $0x58] sm:$0xff]   ;;  %v1415_v17 = vld [vmem:[%s1941_s13 + $0x60] sm:$0xff]   ;;  %v1419_v21 = vld [vmem:[%s1941_s13 + $0x68] sm:$0xff]  }
  0xa6   : > { %1223 = vmatprep.subr.bf16.mxu1 %v1404_v6  ;;  %v1412_v14 = vld [vmem:[%s1941_s13 + $0xd8] sm:$0xff]   ;;  %v1416_v18 = vld [vmem:[%s1941_s13 + $0xe0] sm:$0xff]   ;;  %v1420_v22 = vld [vmem:[%s1941_s13 + $0xe8] sm:$0xff]  }
  0xa7   : > { %v1413_v15 = vld [vmem:[%s1941_s13 + $0x18] sm:$0xff]   ;;  %v1417_v19 = vld [vmem:[%s1941_s13 + $0x20] sm:$0xff]   ;;  %v1421_v23 = vld [vmem:[%s1941_s13 + $0x28] sm:$0xff]  }
  0xa8   : > { %1202 = vmatpush3.bf16.msra.mxu0 %v1405_v7  ;;  %v1414_v16 = vld [vmem:[%s1941_s13 + $0x98] sm:$0xff]   ;;  %v1418_v20 = vld [vmem:[%s1941_s13 + $0xa0] sm:$0xff]   ;;  %v1422_v24 = vld [vmem:[%s1941_s13 + $0xa8] sm:$0xff]  }
  0xa9   : > { %1224 = vmatpush3.bf16.msra.mxu1 %v1406_v8  ;;  %1203 = vmatprep.subr.bf16.mxu0 %v1407_v9  ;;  %v1423_v25 = vld [vmem:[%s1941_s13 + $0x70] sm:$0xff]   ;;  %v1427_v29 = vld [vmem:[%s1941_s13 + $0x78] sm:$0xff]   ;;  %v1437_v55 = vld [vmem:[#allocation8] sm:$0xff] (!%p1173_p9)  }
  0xaa   : > { %1225 = vmatprep.subr.bf16.mxu1 %v1408_v10  ;;  %v1424_v26 = vld [vmem:[%s1941_s13 + $0xf0] sm:$0xff]   ;;  %v1428_v30 = vld [vmem:[%s1941_s13 + $0xf8] sm:$0xff]   ;;  %v1438_v57 = vld [vmem:[#allocation8 + $0x8] sm:$0xff] (!%p1173_p9)  }
  0xab   : > { %v1425_v27 = vld [vmem:[%s1941_s13 + $0x30] sm:$0xff]   ;;  %v1429_v31 = vld [vmem:[%s1941_s13 + $0x38] sm:$0xff]   ;;  %v1445_v59 = vld [vmem:[#allocation9] sm:$0xff] (!%p1173_p9)  }
  0xac   : > { %1204 = vmatpush3.bf16.msra.mxu0 %v1409_v11  ;;  %v1426_v28 = vld [vmem:[%s1941_s13 + $0xb0] sm:$0xff]   ;;  %v1430_v32 = vld [vmem:[%s1941_s13 + $0xb8] sm:$0xff]   ;;  %v1446_v61 = vld [vmem:[#allocation9 + $0x8] sm:$0xff] (!%p1173_p9)  }
  0xad   : > { %1226 = vmatpush3.bf16.msra.mxu1 %v1410_v12  ;;  %1205 = vmatprep.subr.bf16.mxu0 %v1411_v13  ;;  %v1431_v33 = vld [vmem:[%s1934_s11] ss:$16 sps:$4 sm:$0xff]   ;;  %v1433_v34 = vld [vmem:[%s1934_s11 + $0x4] ss:$16 sps:$4 sm:$0xff]   ;;  %v1434_v35 = vld [vmem:[%s1934_s11 + $0x8] ss:$16 sps:$4 sm:$0xff]  }
  0xae   : > { %1227 = vmatprep.subr.bf16.mxu1 %v1412_v14  ;;  %v1436_v36 = vld [vmem:[%s1934_s11 + $0xc] ss:$16 sps:$4 sm:$0xff]   ;;  %701 = vmatprep.mubr.bf16.mxu0 %v1433_v34  ;;  %v387_v46 = vld [vmem:[#allocation2] sm:$0xff]  ;;  %v1441_v62 = vld [vmem:[#allocation8 + $0x20] sm:$0xff] (!%p1173_p9)  }
  0xaf   : > { %742 = vmatprep.mubr.bf16.mxu1 %v1436_v36  ;;  %v388_v51 = vld [vmem:[#allocation2 + $0x8] sm:$0xff]  ;;  %v1439_v58 = vld [vmem:[#allocation8 + $0x10] sm:$0xff] (!%p1173_p9)   ;;  %v1442_v0 = vld [vmem:[#allocation8 + $0x28] sm:$0xff] (!%p1173_p9)  }
  0xb0   : > { %1206 = vmatpush3.bf16.msra.mxu0 %v1413_v15  ;;  %v1440_v60 = vld [vmem:[#allocation8 + $0x18] sm:$0xff] (!%p1173_p9)   ;;  %v1447_v63 = vld [vmem:[#allocation9 + $0x10] sm:$0xff] (!%p1173_p9)   ;;  %v1449_v8 = vld [vmem:[#allocation9 + $0x20] sm:$0xff] (!%p1173_p9)  }
  0xb1   : > { %1228 = vmatpush3.bf16.msra.mxu1 %v1414_v16  ;;  %1207 = vmatprep.subr.bf16.mxu0 %v1415_v17  ;;  %v1174_v3 = vld [vmem:[%s2045_s2] ss:$0 sm:$0xff] (!%p1173_p9)  ;;  %v1448_v4 = vld [vmem:[#allocation9 + $0x18] sm:$0xff] (!%p1173_p9)   ;;  %v1450_v12 = vld [vmem:[#allocation9 + $0x28] sm:$0xff] (!%p1173_p9)  }
  0xb2   : > { %1229 = vmatprep.subr.bf16.mxu1 %v1416_v18  ;;  %v1443_v7 = vld [vmem:[#allocation8 + $0x30] sm:$0xff] (!%p1173_p9)   ;;  %v1444_v11 = vld [vmem:[#allocation8 + $0x38] sm:$0xff] (!%p1173_p9)  }
  0xb3   : > { %v1451_v14 = vld [vmem:[#allocation9 + $0x30] sm:$0xff] (!%p1173_p9)   ;;  %v1452_v15 = vld [vmem:[#allocation9 + $0x38] sm:$0xff] (!%p1173_p9)  }
  0xb4   : > { %1208 = vmatpush3.bf16.msra.mxu0 %v1417_v19  ;;  %v1175_v16 = vld [vmem:[%s2047_s4] ss:$0 sm:$0xff] (!%p1173_p9) }
  0xb5   : > { %1230 = vmatpush3.bf16.msra.mxu1 %v1418_v20  ;;  %1209 = vmatprep.subr.bf16.mxu0 %v1419_v21 }
  0xb6   : > { %1231 = vmatprep.subr.bf16.mxu1 %v1420_v22 }
  0xb8   : > { %1210 = vmatpush3.bf16.msra.mxu0 %v1421_v23 }
  0xb9   : > { %1232 = vmatpush3.bf16.msra.mxu1 %v1422_v24  ;;  %1211 = vmatprep.subr.bf16.mxu0 %v1423_v25 }
  0xba   : > { %1233 = vmatprep.subr.bf16.mxu1 %v1424_v26  ;;  %v1184_v26 = vld [vmem:[%s2049_s6] ss:$0 sm:$0xff] (!%p1173_p9) }
  0xbc   : > { %1212 = vmatpush3.bf16.msra.mxu0 %v1425_v27 }
  0xbd   : > { %1234 = vmatpush3.bf16.msra.mxu1 %v1426_v28  ;;  %1213 = vmatprep.subr.bf16.mxu0 %v1427_v29 }
  0xbe   : > { %1235 = vmatprep.subr.bf16.mxu1 %v1428_v30 }
  0xc0   : > { %1214 = vmatpush3.bf16.msra.mxu0 %v1429_v31 }
  0xc1   : > { %1236 = vmatpush3.bf16.msra.mxu1 %v1430_v32  ;;  %1261 = vmatprep.subr.bf16.mxu0 (!%p1173_p9), %v1673_v56 }
  0xc2   : > { %1281 = vmatprep.subr.bf16.mxu1 (!%p1173_p9), %v1673_v56 }
  0xc3   : > { %702 = vmatmul.mubr.bf16.vlgmr.msra.gmra.mrb[0].mxu0 %v1431_v33 }
  0xc4   : > { %743 = vmatmul.mubr.bf16.vlgmr.msra.gmra.mrb[0].mxu1 %v1434_v35  ;;  %1262 = vmatpush3.bf16.msra.mxu0 (!%p1173_p9), %v1437_v55 }
  0xc5   : > { %1277 = vmatprep.mubr.msk.bf16.mxu0 (!%p1173_p9), %vm1674_vm0, %v1673_v56  ;;  %1263 = vmatprep.subr.bf16.mxu0 (!%p1173_p9), %v1673_v56 }
  0xc6   : > { %1297 = vmatprep.mubr.msk.bf16.mxu1 (!%p1173_p9), %vm1674_vm0, %v1673_v56  ;;  %1282 = vmatpush3.bf16.msra.mxu1 (!%p1173_p9), %v1445_v59 }
  0xc7   : > { %1283 = vmatprep.subr.bf16.mxu1 (!%p1173_p9), %v1673_v56 }
  0xc8   : > { %1264 = vmatpush3.bf16.msra.mxu0 (!%p1173_p9), %v1438_v57 }
  0xc9   : > { %1265 = vmatprep.subr.bf16.mxu0 (!%p1173_p9), %v1673_v56 }
  0xca   : > { %1284 = vmatpush3.bf16.msra.mxu1 (!%p1173_p9), %v1446_v61 }
  0xcb   : > { %1285 = vmatprep.subr.bf16.mxu1 (!%p1173_p9), %v1673_v56 }
  0xcc   : > { %1266 = vmatpush3.bf16.msra.mxu0 (!%p1173_p9), %v1439_v58 }
  0xcd   : > { %1267 = vmatprep.subr.bf16.mxu0 (!%p1173_p9), %v1673_v56 }
  0xce   : > { %1286 = vmatpush3.bf16.msra.mxu1 (!%p1173_p9), %v1447_v63 }
  0xcf   : > { %1287 = vmatprep.subr.bf16.mxu1 (!%p1173_p9), %v1673_v56 }
  0xd0   : > { %1268 = vmatpush3.bf16.msra.mxu0 (!%p1173_p9), %v1440_v60 }
  0xd1   : > { %1269 = vmatprep.subr.bf16.mxu0 (!%p1173_p9), %v1673_v56 }
  0xd2   : > { %1288 = vmatpush3.bf16.msra.mxu1 (!%p1173_p9), %v1448_v4 }
  0xd3   : > { %1289 = vmatprep.subr.bf16.mxu1 (!%p1173_p9), %v1673_v56 }
  0xd4   : > { %1270 = vmatpush3.bf16.msra.mxu0 (!%p1173_p9), %v1441_v62 }
  0xd5   : > { %1271 = vmatprep.subr.bf16.mxu0 (!%p1173_p9), %v1673_v56 }
  0xd6   : > { %1290 = vmatpush3.bf16.msra.mxu1 (!%p1173_p9), %v1449_v8 }
  0xd7   : > { %1291 = vmatprep.subr.bf16.mxu1 (!%p1173_p9), %v1673_v56 }
  0xd8   : > { %1272 = vmatpush3.bf16.msra.mxu0 (!%p1173_p9), %v1442_v0 }
  0xd9   : > { %1273 = vmatprep.subr.bf16.mxu0 (!%p1173_p9), %v1673_v56 }
  0xda   : > { %1292 = vmatpush3.bf16.msra.mxu1 (!%p1173_p9), %v1450_v12 }
  0xdb   : > { %1293 = vmatprep.subr.bf16.mxu1 (!%p1173_p9), %v1673_v56 }
  0xdc   : > { %1274 = vmatpush3.bf16.msra.mxu0 (!%p1173_p9), %v1443_v7 }
  0xdd   : > { %1275 = vmatprep.subr.bf16.mxu0 (!%p1173_p9), %v1673_v56 }
  0xde   : > { %1294 = vmatpush3.bf16.msra.mxu1 (!%p1173_p9), %v1451_v14 }
  0xdf   : > { %1295 = vmatprep.subr.bf16.mxu1 (!%p1173_p9), %v1673_v56 }
  0xe0   : > { %1276 = vmatpush3.bf16.msra.mxu0 (!%p1173_p9), %v1444_v11 }
  0xe2   : > { %1296 = vmatpush3.bf16.msra.mxu1 (!%p1173_p9), %v1452_v15 }
 0x196   : > { %v1215_v37 = vpop.f32.mrb[0].mxu0 }
 0x197   : > { %v1237_v38 = vpop.f32.mrb[0].mxu1  ;;  %v1216_v39 = vpop.f32.mrb[1].mxu0 }
 0x198   : > { %v1217_v40 = vadd.f32 %v1216_v39, %v1215_v37  ;;  %v1238_v41 = vpop.f32.mrb[1].mxu1  ;;  %v1218_v42 = vpop.f32.mrb[2].mxu0 }
 0x199   : > { %v1239_v43 = vadd.f32 %v1238_v41, %v1237_v38  ;;  %v1240_v44 = vpop.f32.mrb[2].mxu1  ;;  %v1219_v45 = vpop.f32.mrb[3].mxu0 }
 0x19a   : > { %v1220_v47 = vadd.f32 %v1219_v45, %v1218_v42  ;;  %v1241_v48 = vpop.f32.mrb[3].mxu1 }
 0x19b   : > { %v745_v49 = vadd.f32 %v1239_v43, %v1217_v40  ;;  %v1242_v50 = vadd.f32 %v1241_v48, %v1240_v44  ;;  %758 = sbr.rel (%p1173_p9) target bundleno = 868 (0x364), region = 72 }
 0x19d   : > { %v751_v52 = vadd.f32 %v745_v49, %v387_v46  ;;  %v748_v53 = vadd.f32 %v1242_v50, %v1220_v47 }
 0x19f   : > { %753 = vst [vmem:[#allocation2] sm:$0xff] %v751_v52  ;;  %v752_v54 = vadd.f32 %v748_v53, %v388_v51 }
 0x1a1   : > { %754 = vst [vmem:[#allocation2 + $0x8] sm:$0xff] %v752_v54 }
 0x1a6   : > { %v759_v1 = vld [vmem:[#allocation2] sm:$0xff] }
 0x1a7   : > { %v768_v5 = vadd.f32 %v1174_v3, %v759_v1 }
 0x1a8   : > { %v760_v2 = vld [vmem:[#allocation2 + $0x8] sm:$0xff] }
 0x1a9   : > { %v769_v6 = vadd.f32 %v1174_v3, %v760_v2  ;;  %v770_v9 = vmax.f32 %v768_v5, 0.0 }
 0x1ab   : > { %v771_v10 = vmax.f32 %v769_v6, 0.0 }
 0x1ad   : > { %v772_v13 = vpack.c.bf16 %v771_v10, %v770_v9 }
 0x1af   : > { %1278 = vmatmul.mubr.bf16.vlgmr.msra.gmra.mrb[0].mxu0 %v772_v13 }
 0x282   : > { %v878_v17 = vpop.f32.mrb[0].mxu0 }
 0x283   : > { %v879_v18 = vadd.f32 %v1175_v16, %v878_v17  ;;  %v1279_v19 = vpop.f32.mrb[1].mxu0 }
 0x284   : > { %v881_v20 = vpop.f32.mrb[2].mxu0 }
 0x285   : > { %v882_v21 = vadd.f32 %v1175_v16, %v881_v20  ;;  %v1280_v22 = vpop.f32.mrb[3].mxu0  ;;  %v885_v23 = vmax.f32 %v879_v18, 0.0 }
 0x287   : > { %v886_v24 = vmax.f32 %v882_v21, 0.0 }
 0x289   : > { %v887_v25 = vpack.c.bf16 %v886_v24, %v885_v23 }
 0x28b   : > { %1298 = vmatmul.mubr.bf16.vlgmr.msra.gmra.mrb[0].mxu1 %v887_v25 }
 0x35e   : > { %v993_v27 = vpop.f32.mrb[0].mxu1 }
 0x35f   : > { %v994_v28 = vadd.f32 %v1184_v26, %v993_v27  ;;  %v1299_v29 = vpop.f32.mrb[1].mxu1 }
 0x360   : > { %v996_v30 = vpop.f32.mrb[2].mxu1 }
 0x361   : > { %1000 = vst [vmem:[#allocation11] sm:$0xff] %v994_v28  ;;  %v997_v31 = vadd.f32 %v1184_v26, %v996_v30  ;;  %v1300_v32 = vpop.f32.mrb[3].mxu1 }
 0x363   : > { %1001 = vst [vmem:[#allocation11 + $0x8] sm:$0xff] %v997_v31 }
 0x364 PF: > { %p1336_p10 = scmp.eq.s32.totalorder %s1747_s30, 1  ;;  %s1675_s23 = smov [#allocation11]  }
 0x365   : > { %s1011_s24 = sshll.u32 %s1675_s23, 4  ;;  %s1012_s24 = int_to_ptr.vmem [resolvable:$true] %s1011_s24 }
 0x366   : > { %s1569_s15 = scalar_lea.vmem %s1012_s24, 256  ;;  %p1576_p6 = scmp.lt.s32.totalorder %s1012_s24, %s1012_s24 }
 0x367   : > { %p1570_p13 = scmp.ne.s32.totalorder %s1012_s24, %s1569_s15  ;;  %p1577_p0 = scmp.lt.s32.totalorder %s1569_s15, %s1569_s15 }
 0x369   : > { %p1571_p7 = pnand %p1570_p13, %p1336_p10  ;;  %p1578_p11 = por %p1577_p0, %p1576_p6 }
 0x36b   : > { %p1572_p1 = pneg %p1571_p7 }
 0x36d   : > { %p1579_p4 = pnand %p1578_p11, %p1572_p1 }
 0x36f   : > { %1582 = shalt.err (!%p1579_p4)
}
 0x370   : > { %s1583_s17 = scalar_lea.hbm %s2050_s7, 256 }
 0x371   : > { %p1584_p8 = scmp.ne.s32.totalorder %s2050_s7, %s1583_s17  ;;  %p1589_p2 = scmp.lt.u32.totalorder %s1583_s17, %s2050_s7 }
 0x373   : > { %p1585_p12 = pnand %p1584_p8, %p1336_p10 }
 0x375   : > { %p1586_p3 = pneg %p1585_p12 }
 0x377   : > { %p1591_p5 = pnand %p1589_p2, %p1586_p3 }
 0x379   : > { %1594 = shalt.err (!%p1591_p5)
}
 0x37a   : > { %s1676_s11 = smov 128   ;;  %s1677_s14 = smov 8  }
 0x37b   : > { %1314 = dma.vmem_to_hbm [thread:$0]  (%p1336_p10), %s1012_s24, 256, %s2050_s7, [#allocation5], %s1676_s11, %s1676_s11, %s1677_s14  }
 0x37c   : > { %1636 = dma.done.wait (%p1336_p10), [#allocation5], 256  }
 0x37d   : > { %1638 = vsyncadd (%p1336_p10), [#allocation5], 4294967040 }
 0x37e PF: > { %s25_s29 = sadd.s32 1, %s1661_s29   ;;  %s2076_s13 = sld [smem:[#allocation18_spill]] }
 0x37f   : > { %p22_p9 = scmp.ge.s32.totalorder %s25_s29, 4   ;;  %s2077_s9 = sld [smem:[#allocation17_spill]] }
 0x380   : > { %s2078_s24 = smov %s1645_s25  ;;  %s2079_s25 = smov %s1649_s26 }
 0x381   : > { %s2081_s27 = smov %s1657_s28  ;;  %24 = sbr.rel (!%p22_p9) target bundleno = 12 (0xc), region = 115 }
 0x384   : > { %s2080_s26 = smov %s2076_s13 }
 0x385   : > { %s2082_s28 = smov %s2077_s9 }
 0x388   :  { %1027 = vsyncpa [#allocation4], 1 }
 0x389   :  { %1029 = vsyncpa [#allocation4 + $0x1], 1 }
 0x38a   :  { %1030 = vsyncpa [#allocation7], 1 }
 0x38b   :  { %1032 = vsyncpa [#allocation7 + $0x1], 1 }
 0x38c   :  { %1033 = vsyncpa [#allocation10], 1 }
 0x38d   :  { %1034 = vsyncpa [#allocation5], 1 }
 0x38e   :  { %1036 = vsyncpa [#allocation5 + $0x1], 1 }

</bundles_post_ra>
